<compile_context>
chip_gen: v7x
topology: tpu7x:2x2x1
jax: 0.10.0
libtpu: 0.0.40
codegen_flags: <defaults>
</compile_context>

<pallas_src>
import functools

import jax
import jax.numpy as jnp
from jax.experimental import pallas as pl
from jax.experimental.pallas import tpu as pltpu

IN_FEATURES = 6
HIDDEN = 10


def _mlp_kernel(x_ref, w1_ref, b1_ref, w2_ref, b2_ref, o_ref):
    """One tile of packed batch rows.

    x_ref : (tile_r, pack*6)   pack batch rows per sublane row (native layout)
    w1_ref: (pack*6, pack*10)  block-diagonal kron(I_pack, W1^T)
    b1_ref: (1, pack*10)       f32
    w2_ref: (pack*10, pack)    block-diagonal kron(I_pack, W2^T)
    b2_ref: (1, 1)             f32 scalar in SMEM
    o_ref : (tile_r, pack)
    """
    x = x_ref[...].astype(jnp.float32)
    # hidden = relu(x @ W1^T + b1), all pack rows at once via the block-diag weights.
    h = jnp.dot(x, w1_ref[...], preferred_element_type=jnp.float32)
    h = jnp.maximum(h + b1_ref[...], 0.0)
    # y = hidden @ W2^T + b2
    y = jnp.dot(h, w2_ref[...], preferred_element_type=jnp.float32)
    o_ref[...] = (y + b2_ref[0, 0]).astype(o_ref.dtype)


@functools.partial(jax.jit, static_argnames=("block_rows",))
def population_nn_forward(x, w1, b1, w2, b2, *, block_rows=4096):
    """Pallas forward pass.

    x:  (B, 6)
    w1: (10, 6), b1: (10,), w2: (1, 10), b2: (1,)   (native PyTorch nn.Linear layout)
    returns (B, 1) in x.dtype.

    block_rows: packed rows (pack batch rows each) per grid step.  4096 packed
    rows ~= 8 MiB of double-buffered VMEM — safe on v5e/v6e/v7x.
    """
    B = x.shape[0]
    assert x.shape == (B, IN_FEATURES)

    # Pack consecutive batch rows along the lane axis — a free row-major reshape,
    # no HBM transpose / pad pass.
    pack = next(p for p in (8, 4, 2, 1) if B % p == 0)
    nrows = B // pack
    xp = x.reshape(nrows, pack * IN_FEATURES)

    # Tiny replicated block-diagonal weights (built once, resident in VMEM).
    eye = jnp.eye(pack, dtype=jnp.float32)
    w1b = jnp.kron(eye, w1.T.astype(jnp.float32))                      # (pack*6, pack*10)
    b1b = jnp.tile(b1.astype(jnp.float32), pack).reshape(1, pack * HIDDEN)
    w2b = jnp.kron(eye, w2.T.astype(jnp.float32))                      # (pack*10, pack)
    b2s = b2.reshape(1, 1).astype(jnp.float32)                         # SMEM scalar

    # Full-array block for small batches (exact), 8-aligned tiles + partial
    # final block for large ones.
    tile_r = nrows if nrows <= block_rows else block_rows
    grid = (pl.cdiv(nrows, tile_r),)

    out = pl.pallas_call(
        _mlp_kernel,
        out_shape=jax.ShapeDtypeStruct((nrows, pack), x.dtype),
        grid=grid,
        in_specs=[
            # x: tiled along the (packed) batch axis, double-buffered per step.
            pl.BlockSpec((tile_r, pack * IN_FEATURES), lambda i: (i, 0)),
            # Weights / b1: constant-index blocks -> DMA'd once, stay in VMEM.
            pl.BlockSpec((pack * IN_FEATURES, pack * HIDDEN), lambda i: (0, 0)),
            pl.BlockSpec((1, pack * HIDDEN), lambda i: (0, 0)),
            pl.BlockSpec((pack * HIDDEN, pack), lambda i: (0, 0)),
            # b2: scalar in SMEM.
            pl.BlockSpec(memory_space=pltpu.MemorySpace.SMEM),
        ],
        out_specs=pl.BlockSpec((tile_r, pack), lambda i: (i, 0)),
        compiler_params=pltpu.CompilerParams(
            dimension_semantics=("parallel",),      # megacore sharding on v7x
            vmem_limit_bytes=32 * 1024 * 1024,
        ),
    )(xp, w1b, b1b, w2b, b2s)

    # Free row-major reshape back to the PyTorch (B, 1) shape.
    return out.reshape(B, 1)


def init_params(key):
    """Deterministic parameter init matching nn.Linear shapes (PyTorch layout)."""
    k1, k2, k3, k4 = jax.random.split(key, 4)
    w1 = jax.random.uniform(k1, (10, 6), jnp.float32, -1.0, 1.0) / jnp.sqrt(6.0)
    b1 = jax.random.uniform(k2, (10,), jnp.float32, -1.0, 1.0) / jnp.sqrt(6.0)
    w2 = jax.random.uniform(k3, (1, 10), jnp.float32, -1.0, 1.0) / jnp.sqrt(10.0)
    b2 = jax.random.uniform(k4, (1,), jnp.float32, -1.0, 1.0) / jnp.sqrt(10.0)
    return w1, b1, w2, b2


def reference_forward(x, w1, b1, w2, b2):
    """Pure-JAX reference matching torch: relu(x @ W1.T + b1) @ W2.T + b2."""
    h = jnp.maximum(x @ w1.T + b1, 0.0)
    return h @ w2.T + b2


if __name__ == "__main__":
    key = jax.random.PRNGKey(0)
    kx, kp = jax.random.split(key)
    w1, b1, w2, b2 = init_params(kp)

    # Primary small case: batch=8 -> pack=8, single full block.
    x8 = jax.random.normal(kx, (8, 6), jnp.float32)
    out8 = jax.block_until_ready(population_nn_forward(x8, w1, b1, w2, b2))
    ref8 = reference_forward(x8, w1, b1, w2, b2)
    assert out8.shape == (8, 1), out8.shape
    assert jnp.allclose(out8, ref8, atol=1e-5, rtol=1e-5), (out8, ref8)

    # Odd batch: pack falls back to 1, full-array (non-8/128) block.
    x37 = jax.random.normal(jax.random.fold_in(kx, 1), (37, 6), jnp.float32)
    out37 = jax.block_until_ready(population_nn_forward(x37, w1, b1, w2, b2))
    ref37 = reference_forward(x37, w1, b1, w2, b2)
    assert out37.shape == (37, 1), out37.shape
    assert jnp.allclose(out37, ref37, atol=1e-5, rtol=1e-5)

    # Multi-step grid with a partial final block: batch=2000 -> 250 packed rows,
    # 128-row tiles -> grid=(2,).
    x2k = jax.random.normal(jax.random.fold_in(kx, 2), (2000, 6), jnp.float32)
    out2k = jax.block_until_ready(
        population_nn_forward(x2k, w1, b1, w2, b2, block_rows=128))
    ref2k = reference_forward(x2k, w1, b1, w2, b2)
    assert out2k.shape == (2000, 1), out2k.shape
    assert jnp.allclose(out2k, ref2k, atol=1e-5, rtol=1e-5)

    print("KERNEL_OK")
</pallas_src>

<mosaic_0001>
module attributes {stable_mosaic.version = 11 : i64} {
  func.func @_mlp_kernel(%arg0: i32, %arg1: memref<1x48xf32, #tpu.memory_space<vmem>>, %arg2: memref<48x80xf32, #tpu.memory_space<vmem>>, %arg3: memref<1x80xf32, #tpu.memory_space<vmem>>, %arg4: memref<80x8xf32, #tpu.memory_space<vmem>>, %arg5: memref<1x1xf32, #tpu.memory_space<smem>>, %arg6: memref<1x8xf32, #tpu.memory_space<vmem>>) attributes {dimension_semantics = [#tpu.dimension_semantics<parallel>], iteration_bounds = array<i64: 1>, scalar_prefetch = 0 : i64, scratch_operands = 0 : i64, tpu.core_type = #tpu.core_type<tc>, window_params = [{transform_indices = @transform_0, window_bounds = array<i64: 1, 48>}, {pipeline_mode = #tpu.pipeline_mode<synchronous>, transform_indices = @transform_1, window_bounds = array<i64: 48, 80>}, {pipeline_mode = #tpu.pipeline_mode<synchronous>, transform_indices = @transform_2, window_bounds = array<i64: 1, 80>}, {pipeline_mode = #tpu.pipeline_mode<synchronous>, transform_indices = @transform_3, window_bounds = array<i64: 80, 8>}, {transform_indices = @transform_4, window_bounds = array<i64: 1, 1>}, {transform_indices = @transform_5, window_bounds = array<i64: 1, 8>}]} {
    %c0 = arith.constant 0 : index
    %c0_0 = arith.constant 0 : index
    %0 = vector.load %arg1[%c0, %c0_0] : memref<1x48xf32, #tpu.memory_space<vmem>>, vector<1x48xf32>
    %c0_1 = arith.constant 0 : index
    %c0_2 = arith.constant 0 : index
    %1 = vector.load %arg2[%c0_1, %c0_2] : memref<48x80xf32, #tpu.memory_space<vmem>>, vector<48x80xf32>
    %cst = arith.constant dense<0.000000e+00> : vector<1x80xf32>
    %2 = tpu.matmul %0, %1, %cst {dimension_numbers = #tpu.dot_dimension_numbers<[1], [0], [0], [1], [0, 0, 1, 1], [], []>} : vector<1x48xf32>, vector<48x80xf32>, vector<1x80xf32> -> vector<1x80xf32>
    %c0_3 = arith.constant 0 : index
    %c0_4 = arith.constant 0 : index
    %3 = vector.load %arg3[%c0_3, %c0_4] : memref<1x80xf32, #tpu.memory_space<vmem>>, vector<1x80xf32>
    %4 = arith.addf %2, %3 : vector<1x80xf32>
    %cst_5 = arith.constant 0.000000e+00 : f32
    %5 = vector.broadcast %cst_5 : f32 to vector<1x80xf32>
    %6 = arith.maximumf %4, %5 : vector<1x80xf32>
    %c0_6 = arith.constant 0 : index
    %c0_7 = arith.constant 0 : index
    %7 = vector.load %arg4[%c0_6, %c0_7] : memref<80x8xf32, #tpu.memory_space<vmem>>, vector<80x8xf32>
    %cst_8 = arith.constant dense<0.000000e+00> : vector<1x8xf32>
    %8 = tpu.matmul %6, %7, %cst_8 {dimension_numbers = #tpu.dot_dimension_numbers<[1], [0], [0], [1], [0, 0, 1, 1], [], []>} : vector<1x80xf32>, vector<80x8xf32>, vector<1x8xf32> -> vector<1x8xf32>
    %c0_9 = arith.constant 0 : index
    %c0_10 = arith.constant 0 : index
    %9 = memref.load %arg5[%c0_9, %c0_10] : memref<1x1xf32, #tpu.memory_space<smem>>
    %10 = vector.broadcast %9 : f32 to vector<1x8xf32>
    %11 = arith.addf %8, %10 : vector<1x8xf32>
    %c0_11 = arith.constant 0 : index
    %c0_12 = arith.constant 0 : index
    %12 = vector.load %arg6[%c0_11, %c0_12] : memref<1x8xf32, #tpu.memory_space<vmem>>, vector<1x8xf32>
    tpu.vector_store %arg6[%c0_11, %c0_12], %11 {strides = array<i32>} : memref<1x8xf32, #tpu.memory_space<vmem>>, vector<1x8xf32>,
    return
  }
  func.func @transform_0(%arg0: i32) -> (i32, i32) {
    %c0_i32 = arith.constant 0 : i32
    %c0_i32_0 = arith.constant 0 : i32
    return %arg0, %c0_i32 : i32, i32
  }
  func.func @transform_1(%arg0: i32) -> (i32, i32) {
    %c0_i32 = arith.constant 0 : i32
    %c0_i32_0 = arith.constant 0 : i32
    %c0_i32_1 = arith.constant 0 : i32
    return %c0_i32, %c0_i32_0 : i32, i32
  }
  func.func @transform_2(%arg0: i32) -> (i32, i32) {
    %c0_i32 = arith.constant 0 : i32
    %c0_i32_0 = arith.constant 0 : i32
    %c0_i32_1 = arith.constant 0 : i32
    return %c0_i32, %c0_i32_0 : i32, i32
  }
  func.func @transform_3(%arg0: i32) -> (i32, i32) {
    %c0_i32 = arith.constant 0 : i32
    %c0_i32_0 = arith.constant 0 : i32
    %c0_i32_1 = arith.constant 0 : i32
    return %c0_i32, %c0_i32_0 : i32, i32
  }
  func.func @transform_4(%arg0: i32) -> (i32, i32) {
    %c0_i32 = arith.constant 0 : i32
    %c0_i32_0 = arith.constant 0 : i32
    %c0_i32_1 = arith.constant 0 : i32
    return %c0_i32, %c0_i32_0 : i32, i32
  }
  func.func @transform_5(%arg0: i32) -> (i32, i32) {
    %c0_i32 = arith.constant 0 : i32
    %c0_i32_0 = arith.constant 0 : i32
    return %arg0, %c0_i32 : i32, i32
  }
}

</mosaic_0001>

<bundles_post_ra>
// kernel: tile.9
= control target key start
LH: loop header
LB: loop body
LE: loop exit
PB: predicated region body
PF: predicated region fallthrough
CT: control target
= control target key end

     0   :  { %s67_s10 = smov 70   ;;  %s68_s11 = smov 50   ;;  %vm3_vm0 = vcmask 80896   ;;  %vm9_vm1 = vcmask 654896   ;;  %vm15_vm2 = vcmask 572896   ;;  %vm21_vm3 = vcmask 490896   ;;  %s111_s0 = inlined_call_operand.vmem [shape: f32[8,10], index: 0, kind: input, shape index: {}]   ;;  %s112_s1 = inlined_call_operand.vmem [shape: f32[1,80], index: 1, kind: output, shape index: {}]  }
   0x1   :  { %v53_v0 = vld [vmem:[%s111_s0 + $0x7] sm:$0x1]   ;;  %v55_v1 = vld [vmem:[%s111_s0 + $0x5] sm:$0x1]   ;;  %v54_v2 = vld [vmem:[%s111_s0 + $0x6] sm:$0x1]  }
   0x2   :  { %7 = vrot.lane.b32.xlu0 %v53_v0, %s67_s10  ;;  %19 = vrot.lane.b32.xlu1 %v55_v1, %s68_s11  ;;  %v56_v3 = vld [vmem:[%s111_s0 + $0x4] sm:$0x1]   ;;  %v2_v4 = vld [vmem:[%s111_s0] sm:$0x1]   ;;  %s69_s18 = smov 60   ;;  %s70_s19 = smov 40  }
   0x3   :  { %4 = vst.msk [vmem:[#allocation0] sm:$0x1] %vm3_vm0, %v2_v4   ;;  %v57_v5 = vld [vmem:[%s111_s0 + $0x3] sm:$0x1]   ;;  %v58_v6 = vld [vmem:[%s111_s0 + $0x2] sm:$0x1]  }
   0x4   :  { %s71_s24 = smov 30   ;;  %s72_s25 = smov 20   ;;  %v59_v7 = vld [vmem:[%s111_s0 + $0x1] sm:$0x1]   ;;  %vm27_vm4 = vcmask 408896   ;;  %vm33_vm5 = vcmask 326896  }
   0x5   :  { %s73_s0 = smov 10   ;;  %vm39_vm6 = vcmask 244896   ;;  %vm45_vm7 = vcmask 162896  }
   0x6   :  { %13 = vrot.lane.b32.xlu0 %v54_v2, %s69_s18  ;;  %25 = vrot.lane.b32.xlu1 %v56_v3, %s70_s19 }
   0xa   :  { %31 = vrot.lane.b32.xlu0 %v57_v5, %s71_s24  ;;  %37 = vrot.lane.b32.xlu1 %v58_v6, %s72_s25 }
   0xe   :  { %43 = vrot.lane.b32.xlu0 %v59_v7, %s73_s0 }
  0x74   :  { %v8_v8 = vpop.permute.xlu0 %7   ;;  %v20_v9 = vpop.permute.xlu1 %19  }
  0x75   :  { %10 = vst.msk [vmem:[#allocation0] sm:$0x1] %vm9_vm1, %v8_v8  }
  0x78   :  { %v14_v10 = vpop.permute.xlu0 %13   ;;  %v26_v11 = vpop.permute.xlu1 %25  }
  0x79   :  { %16 = vst.msk [vmem:[#allocation0] sm:$0x1] %vm15_vm2, %v14_v10  }
  0x7a   :  { %22 = vst.msk [vmem:[#allocation0] sm:$0x1] %vm21_vm3, %v20_v9  }
  0x7b   :  { %28 = vst.msk [vmem:[#allocation0] sm:$0x1] %vm27_vm4, %v26_v11  }
  0x7c   :  { %v32_v12 = vpop.permute.xlu0 %31   ;;  %v38_v13 = vpop.permute.xlu1 %37  }
  0x7d   :  { %34 = vst.msk [vmem:[#allocation0] sm:$0x1] %vm33_vm5, %v32_v12  }
  0x7e   :  { %40 = vst.msk [vmem:[#allocation0] sm:$0x1] %vm39_vm6, %v38_v13  }
  0x80   :  { %v44_v14 = vpop.permute.xlu0 %43  }
  0x81   :  { %46 = vst.msk [vmem:[#allocation0] sm:$0x1] %vm45_vm7, %v44_v14  }
  0x88   :  { %v50_v15 = vld [vmem:[#allocation0] sm:$0x1] }
  0x89   :  { %52 = vst [vmem:[%s112_s1] sm:$0x1] %v50_v15 }

</bundles_post_ra>
